<compile_context>
chip_gen: v7x
topology: tpu7x:2x2x1
jax: 0.10.0
libtpu: 0.0.40
codegen_flags: <defaults>
</compile_context>

<pallas_src>
import math

import jax
import jax.numpy as jnp
from jax.experimental import pallas as pl
from jax.experimental.pallas import tpu as pltpu

_STEP_VMEM_TARGET_BYTES = 16 * 1024 * 1024   # one buffer set (x + out + pe blocks)
_RESIDENT_PE_VMEM_BYTES = 4 * 1024 * 1024    # budget for the resident (padded) pe tile
_VMEM_LIMIT_BYTES = 48 * 1024 * 1024         # 2 buffer sets + resident pe, < 64 MiB (v7x)


def make_positional_encoding(d_model: int, max_len: int = 100,
                             dtype=jnp.float32) -> jnp.ndarray:
    """Sinusoidal table, shape (max_len, 1, d_model) like the PyTorch buffer,
    built once in the activation dtype (no per-forward casting)."""
    pos = jnp.arange(max_len, dtype=jnp.float32)[:, None]                 # (L, 1)
    div_term = jnp.exp(
        jnp.arange(0, d_model, 2, dtype=jnp.float32)
        * -(math.log(10000.0) / d_model))                                 # (ceil(D/2),)
    ang = pos * div_term                                                  # (L, ceil(D/2))
    pe = jnp.zeros((max_len, d_model), dtype=jnp.float32)
    pe = pe.at[:, 0::2].set(jnp.sin(ang))
    pe = pe.at[:, 1::2].set(jnp.cos(ang)[:, : d_model // 2])              # odd-D safe
    return pe[:, None, :].astype(dtype)                                   # (L, 1, D)


def _add_pe_resident_kernel(x_ref, pe_ref, o_ref):
    # pe_ref: (S_pad, 1, D), fully VMEM-resident (constant block index -> DMA'd
    # once).  Slice this step's rows and sublane-broadcast-add over batch (VPU).
    ts = x_ref.shape[0]
    start = pl.program_id(0) * ts
    o_ref[...] = x_ref[...] + pe_ref[pl.ds(start, ts)]


def _add_pe_streamed_kernel(x_ref, pe_ref, o_ref):
    # pe_ref: (ts, 1, D) block streamed per step; broadcast add over batch.
    o_ref[...] = x_ref[...] + pe_ref[...]


def positional_encoding_forward(x: jnp.ndarray, pe: jnp.ndarray, *,
                                block_rows: int | None = None,
                                donate_x: bool = False,
                                resident_pe_vmem_bytes: int = _RESIDENT_PE_VMEM_BYTES,
                                ) -> jnp.ndarray:
    """x: (S, B, D); pe: (max_len, 1, D) (or (max_len, D)) in x.dtype."""
    S, B, D = x.shape
    if pe.ndim == 2:
        pe = pe[:, None, :]
    max_len = pe.shape[0]
    assert S <= max_len, f"seq_len {S} exceeds max_len {max_len}"
    assert pe.shape == (max_len, 1, D)
    assert pe.dtype == x.dtype, "build pe in the activation dtype at setup"

    itemsize = jnp.dtype(x.dtype).itemsize
    b_pad = max(B, 8)                           # sublane padding of (B, D) minor dims
    row_x = 2 * b_pad * D * itemsize            # x block + out block VMEM bytes per seq row

    def tile_rows(per_row_bytes):
        if block_rows is not None:
            return max(1, min(S, block_rows))
        ts = max(1, min(S, _STEP_VMEM_TARGET_BYTES // per_row_bytes))
        n = pl.cdiv(S, ts)
        # v7x megacore: force an even number (>= 2) of "parallel" S-steps so both
        # TensorCores stream half the rows each (neutral on single-TC v5e/v6e).
        if S >= 16 and (n < 2 or n % 2):
            n = max(2, n + (n % 2))
            ts = min(S, ((pl.cdiv(S, n) + 7) // 8) * 8)
        return ts

    ts = tile_rows(row_x)
    n_blocks = pl.cdiv(S, ts)
    s_pad = n_blocks * ts

    # Keep the whole used pe table VMEM-resident when its (sublane-padded) tile is
    # small: constant block index -> DMA'd exactly once, no per-step pe stream.
    pe_resident = s_pad * 8 * D * itemsize <= resident_pe_vmem_bytes
    if not pe_resident:
        # Streamed pe blocks join the pipeline; include their padded rows in the budget.
        ts = tile_rows(row_x + 8 * D * itemsize)
        n_blocks = pl.cdiv(S, ts)
        s_pad = n_blocks * ts

    if pe_resident:
        take = min(s_pad, max_len)
        pe_arg = pe[:take]
        if s_pad > take:  # grid padding reaches past max_len; padded rows never stored
            pe_arg = jnp.pad(pe_arg, ((0, s_pad - take), (0, 0), (0, 0)))
        pe_spec = pl.BlockSpec((s_pad, 1, D), lambda i: (0, 0, 0))   # resident
        kernel = _add_pe_resident_kernel
    else:
        pe_arg = pe
        pe_spec = pl.BlockSpec((ts, 1, D), lambda i: (i, 0, 0))      # streamed
        kernel = _add_pe_streamed_kernel

    cost = pl.CostEstimate(
        flops=S * B * D,
        transcendentals=0,
        bytes_accessed=(2 * S * B * D + S * D) * itemsize,
    )

    return pl.pallas_call(
        kernel,
        out_shape=jax.ShapeDtypeStruct((S, B, D), x.dtype),
        grid=(n_blocks,),
        in_specs=[
            # Minor dims (B, D) equal the full array dims -> (8,128) rule holds
            # for any B, D; dense when B >= 8 and D % 128 == 0.
            pl.BlockSpec((ts, B, D), lambda i: (i, 0, 0)),
            pe_spec,
        ],
        out_specs=pl.BlockSpec((ts, B, D), lambda i: (i, 0, 0)),
        compiler_params=pltpu.CompilerParams(
            dimension_semantics=("parallel",),        # v7x: shard S-tiles on 2 TCs
            vmem_limit_bytes=_VMEM_LIMIT_BYTES,
        ),
        cost_estimate=cost,
        # Saves HBM footprint only (not bandwidth) when the caller can donate x.
        input_output_aliases=({0: 0} if donate_x else {}),
    )(x, pe_arg)


if __name__ == "__main__":
    key = jax.random.PRNGKey(0)
    MAX_LEN = 100

    def reference(x, pe):
        return x + pe[: x.shape[0]]     # pe (max_len, 1, D) broadcasts over batch

    # 1) Original toy module shape (seq=8, batch=2, d_model=32): grid=1, resident pe.
    pe32 = make_positional_encoding(32, MAX_LEN)
    x1 = jax.random.normal(key, (8, 2, 32), dtype=jnp.float32)
    o1 = jax.block_until_ready(positional_encoding_forward(x1, pe32))
    assert o1.shape == x1.shape
    assert jnp.allclose(o1, reference(x1, pe32), atol=1e-6), "mismatch (toy shape)"

    # 2) Dense minor dims (B=8 sublanes, D=128 lanes); auto tiling now yields an
    #    even >=2-step grid so both v7x TensorCores get work.
    pe128 = make_positional_encoding(128, MAX_LEN)
    x2 = jax.random.normal(jax.random.fold_in(key, 1), (64, 8, 128), jnp.float32)
    o2 = jax.block_until_ready(positional_encoding_forward(x2, pe128))
    assert jnp.allclose(o2, reference(x2, pe128), atol=1e-6), "mismatch (dense shape)"

    # 3) S == max_len with a tile that does not divide S: exercises the padded
    #    tail of the resident pe table and the partial last x/out block.
    x3 = jax.random.normal(jax.random.fold_in(key, 2), (100, 8, 128), jnp.float32)
    o3 = jax.block_until_ready(positional_encoding_forward(x3, pe128))
    assert jnp.allclose(o3, reference(x3, pe128), atol=1e-6), "mismatch (S == max_len)"

    # 4) Streamed-pe fallback (forced): per-step pe blocks with edge clamping on
    #    the final partial block.
    o4 = jax.block_until_ready(
        positional_encoding_forward(x3, pe128, block_rows=64,
                                    resident_pe_vmem_bytes=0))
    assert jnp.allclose(o4, reference(x3, pe128), atol=1e-6), "mismatch (streamed pe)"

    # 5) Explicit uneven block_rows override: resident pe sliced with non-zero
    #    dynamic starts across 3 grid steps.
    x5 = jax.random.normal(jax.random.fold_in(key, 3), (70, 8, 128), jnp.float32)
    o5 = jax.block_until_ready(positional_encoding_forward(x5, pe128, block_rows=32))
    assert jnp.allclose(o5, reference(x5, pe128), atol=1e-6), "mismatch (uneven grid)"

    print("KERNEL_OK")
</pallas_src>

<mosaic_0001>
module attributes {stable_mosaic.version = 11 : i64} {
  func.func @_add_pe_resident_kernel(%arg0: i32, %arg1: memref<8x2x32xf32, #tpu.memory_space<vmem>>, %arg2: memref<8x1x32xf32, #tpu.memory_space<vmem>>, %arg3: memref<8x2x32xf32, #tpu.memory_space<vmem>>) attributes {dimension_semantics = [#tpu.dimension_semantics<parallel>], iteration_bounds = array<i64: 1>, scalar_prefetch = 0 : i64, scratch_operands = 0 : i64, tpu.core_type = #tpu.core_type<tc>, window_params = [{transform_indices = @transform_0, window_bounds = array<i64: 8, 2, 32>}, {pipeline_mode = #tpu.pipeline_mode<synchronous>, transform_indices = @transform_1, window_bounds = array<i64: 8, 1, 32>}, {transform_indices = @transform_2, window_bounds = array<i64: 8, 2, 32>}]} {
    %c8_i32 = arith.constant 8 : i32
    %0 = arith.muli %arg0, %c8_i32 : i32
    %c0 = arith.constant 0 : index
    %c0_0 = arith.constant 0 : index
    %c0_1 = arith.constant 0 : index
    %1 = vector.load %arg1[%c0, %c0_0, %c0_1] : memref<8x2x32xf32, #tpu.memory_space<vmem>>, vector<8x2x32xf32>
    %2 = arith.index_cast %0 : i32 to index
    %c0_2 = arith.constant 0 : index
    %c0_3 = arith.constant 0 : index
    %3 = vector.load %arg2[%2, %c0_2, %c0_3] : memref<8x1x32xf32, #tpu.memory_space<vmem>>, vector<8x1x32xf32>
    %4 = vector.broadcast %3 : vector<8x1x32xf32> to vector<8x2x32xf32>
    %5 = arith.addf %1, %4 : vector<8x2x32xf32>
    %c0_4 = arith.constant 0 : index
    %c0_5 = arith.constant 0 : index
    %c0_6 = arith.constant 0 : index
    %6 = vector.load %arg3[%c0_4, %c0_5, %c0_6] : memref<8x2x32xf32, #tpu.memory_space<vmem>>, vector<8x2x32xf32>
    tpu.vector_store %arg3[%c0_4, %c0_5, %c0_6], %5 {strides = array<i32>} : memref<8x2x32xf32, #tpu.memory_space<vmem>>, vector<8x2x32xf32>,
    return
  }
  func.func @transform_0(%arg0: i32) -> (i32, i32, i32) {
    %c0_i32 = arith.constant 0 : i32
    %c0_i32_0 = arith.constant 0 : i32
    %c0_i32_1 = arith.constant 0 : i32
    return %arg0, %c0_i32, %c0_i32_0 : i32, i32, i32
  }
  func.func @transform_1(%arg0: i32) -> (i32, i32, i32) {
    %c0_i32 = arith.constant 0 : i32
    %c0_i32_0 = arith.constant 0 : i32
    %c0_i32_1 = arith.constant 0 : i32
    %c0_i32_2 = arith.constant 0 : i32
    return %c0_i32, %c0_i32_0, %c0_i32_1 : i32, i32, i32
  }
  func.func @transform_2(%arg0: i32) -> (i32, i32, i32) {
    %c0_i32 = arith.constant 0 : i32
    %c0_i32_0 = arith.constant 0 : i32
    %c0_i32_1 = arith.constant 0 : i32
    return %arg0, %c0_i32, %c0_i32_0 : i32, i32, i32
  }
}

</mosaic_0001>

<bundles_post_ra>
// kernel: tpu_custom_call.1
= control target key start
LH: loop header
LB: loop body
LE: loop exit
PB: predicated region body
PF: predicated region fallthrough
CT: control target
= control target key end

     0   :  { %7 = vsyncpa [#allocation3], 0  ;;  %s303_s0 = inlined_call_operand.hbm [shape: f32[8,2,32], index: 0, kind: input, shape index: {}]   ;;  %s304_s1 = inlined_call_operand.hbm [shape: f32[8,1,32], index: 1, kind: input, shape index: {}]   ;;  %s305_s2 = inlined_call_operand.hbm [shape: f32[8,2,32], index: 2, kind: output, shape index: {}]  }
   0x1   :  { %8 = vsyncpa [#allocation6], 0 }
   0x2   :  { %9 = vsyncpa [#allocation4], 0  ;;  %s228_s9 = smov [#allocation2]   ;;  %s156_s13 = scalar_lea.hbm %s303_s0, 256 }
   0x3   :  { %s15_s10 = sshll.u32 %s228_s9, 4  ;;  %p157_p0 = scmp.ne.s32.totalorder %s303_s0, %s156_s13  ;;  %s16_s10 = int_to_ptr.vmem [resolvable:$true] %s15_s10 }
   0x4   :  { %p160_p1 = scmp.lt.u32.totalorder %s156_s13, %s303_s0 }
   0x6   :  { %p162_p2 = pnand %p160_p1, %p157_p0 }
   0x8   :  { %165 = shalt.err (!%p162_p2)
}
   0x9   :  { %s166_s18 = scalar_lea.vmem %s16_s10, 256  ;;  %p171_p4 = scmp.lt.s32.totalorder %s16_s10, %s16_s10 }
   0xa   :  { %p167_p3 = scmp.ne.s32.totalorder %s16_s10, %s166_s18  ;;  %p172_p5 = scmp.lt.s32.totalorder %s166_s18, %s166_s18 }
   0xc   :  { %p173_p6 = por %p172_p5, %p171_p4 }
   0xe   :  { %p174_p7 = pnand %p173_p6, %p167_p3 }
  0x10   :  { %177 = shalt.err (!%p174_p7)
}
  0x11   :  { %s229_s19 = smov 32   ;;  %s230_s20 = smov 2  }
  0x12   :  { %21 = dma.hbm_to_vmem [thread:$0]  %s303_s0, 256, %s16_s10, [#allocation3], %s229_s19, %s229_s19, %s230_s20  }
  0x13   :  { %s231_s23 = smov [#allocation5]   ;;  %s178_s27 = scalar_lea.hbm %s304_s1, 128 }
  0x14   :  { %s27_s24 = sshll.u32 %s231_s23, 4  ;;  %p179_p8 = scmp.ne.s32.totalorder %s304_s1, %s178_s27  ;;  %s28_s24 = int_to_ptr.vmem [resolvable:$true] %s27_s24 }
  0x15   :  { %p182_p9 = scmp.lt.u32.totalorder %s178_s27, %s304_s1 }
  0x17   :  { %p184_p10 = pnand %p182_p9, %p179_p8 }
  0x19   :  { %187 = shalt.err (!%p184_p10)
}
  0x1a   :  { %s188_s4 = scalar_lea.vmem %s28_s24, 128  ;;  %p193_p12 = scmp.lt.s32.totalorder %s28_s24, %s28_s24 }
  0x1b   :  { %p189_p11 = scmp.ne.s32.totalorder %s28_s24, %s188_s4  ;;  %p194_p13 = scmp.lt.s32.totalorder %s188_s4, %s188_s4 }
  0x1d   :  { %p195_p0 = por %p194_p13, %p193_p12 }
  0x1f   :  { %p196_p1 = pnand %p195_p0, %p189_p11 }
  0x21   :  { %199 = shalt.err (!%p196_p1)
}
  0x22   :  { %s232_s0 = smov 16   ;;  %s233_s5 = smov 1  }
  0x23   :  { %33 = dma.hbm_to_vmem [thread:$0]  %s304_s1, 128, %s28_s24, [#allocation6], %s232_s0, %s232_s0, %s233_s5  }
  0x24   :  { %222 = dma.done.wait [#allocation3], 256  }
  0x25   :  { %223 = vsyncadd [#allocation3], 4294967040 }
  0x26   :  { %224 = dma.done.wait [#allocation6], 128  }
  0x27   :  { %225 = vsyncadd [#allocation6], 4294967168  ;;  %vm114_vm0 = vcmask 254976   ;;  %s234_s8 = smov [#allocation7]   ;;  %v41_v0 = vld [vmem:[#allocation2] sm:$0x3] }
  0x28   :  { %s277_s9 = sshll.u32 %s234_s8, 4  ;;  %v141_v1 = vld [vmem:[#allocation5] ss:$0 sm:$0xff]  ;;  %v42_v2 = vld [vmem:[#allocation2 + $0x2] sm:$0x3]  ;;  %s129_s9 = int_to_ptr.vmem [resolvable:$true] %s277_s9 }
  0x29   :  { %v106_v3 = vadd.f32 %v141_v1, %v41_v0  ;;  %v142_v4 = vld [vmem:[#allocation5 + $0x1] ss:$0 sm:$0xff]  ;;  %v43_v5 = vld [vmem:[#allocation2 + $0x4] sm:$0x3]  ;;  %v143_v6 = vld [vmem:[#allocation5 + $0x2] ss:$0 sm:$0xff]  ;;  %p205_p3 = scmp.lt.s32.totalorder %s129_s9, %s129_s9 }
  0x2a   :  { %v107_v7 = vadd.f32 %v142_v4, %v42_v2  ;;  %v108_v8 = vadd.f32 %v143_v6, %v43_v5  ;;  %v44_v9 = vld [vmem:[#allocation2 + $0x6] sm:$0x3]  ;;  %v144_v10 = vld [vmem:[#allocation5 + $0x3] ss:$0 sm:$0xff]  ;;  %v45_v11 = vld [vmem:[#allocation2 + $0x8] sm:$0x3] }
  0x2b   :  { %115 = vst.msk [vmem:[#allocation7] sm:$0x3] %vm114_vm0, %v106_v3  ;;  %v109_v12 = vadd.f32 %v144_v10, %v44_v9  ;;  %v145_v13 = vld [vmem:[#allocation5 + $0x4] ss:$0 sm:$0xff]  ;;  %v46_v14 = vld [vmem:[#allocation2 + $0xa] sm:$0x3] }
  0x2c   :  { %v146_v15 = vld [vmem:[#allocation5 + $0x5] ss:$0 sm:$0xff]  ;;  %116 = vst.msk [vmem:[#allocation7 + $0x2] sm:$0x3] %vm114_vm0, %v107_v7  ;;  %117 = vst.msk [vmem:[#allocation7 + $0x4] sm:$0x3] %vm114_vm0, %v108_v8  ;;  %v110_v16 = vadd.f32 %v145_v13, %v45_v11 }
  0x2d   :  { %v111_v17 = vadd.f32 %v146_v15, %v46_v14  ;;  %v47_v18 = vld [vmem:[#allocation2 + $0xc] sm:$0x3]  ;;  %v147_v19 = vld [vmem:[#allocation5 + $0x6] ss:$0 sm:$0xff]  ;;  %v48_v20 = vld [vmem:[#allocation2 + $0xe] sm:$0x3] }
  0x2e   :  { %118 = vst.msk [vmem:[#allocation7 + $0x6] sm:$0x3] %vm114_vm0, %v109_v12  ;;  %v112_v21 = vadd.f32 %v147_v19, %v47_v18  ;;  %v148_v22 = vld [vmem:[#allocation5 + $0x7] ss:$0 sm:$0xff]  ;;  %119 = vst.msk [vmem:[#allocation7 + $0x8] sm:$0x3] %vm114_vm0, %v110_v16 }
  0x2f   :  { %120 = vst.msk [vmem:[#allocation7 + $0xa] sm:$0x3] %vm114_vm0, %v111_v17  ;;  %v113_v23 = vadd.f32 %v148_v22, %v48_v20  ;;  %s200_s1 = scalar_lea.vmem %s129_s9, 256 }
  0x30   :  { %121 = vst.msk [vmem:[#allocation7 + $0xc] sm:$0x3] %vm114_vm0, %v112_v21  ;;  %p201_p2 = scmp.ne.s32.totalorder %s129_s9, %s200_s1  ;;  %p206_p4 = scmp.lt.s32.totalorder %s200_s1, %s200_s1 }
  0x31   :  { %122 = vst.msk [vmem:[#allocation7 + $0xe] sm:$0x3] %vm114_vm0, %v113_v23 }
  0x32   :  { %p207_p5 = por %p206_p4, %p205_p3 }
  0x34   :  { %p208_p6 = pnand %p207_p5, %p201_p2 }
  0x36   :  { %211 = shalt.err (!%p208_p6)
}
  0x37   :  { %s212_s12 = scalar_lea.hbm %s305_s2, 256 }
  0x38   :  { %p213_p7 = scmp.ne.s32.totalorder %s305_s2, %s212_s12  ;;  %p216_p8 = scmp.lt.u32.totalorder %s212_s12, %s305_s2 }
  0x3a   :  { %p218_p9 = pnand %p216_p8, %p213_p7 }
  0x3c   :  { %221 = shalt.err (!%p218_p9)
}
  0x3d   :  { %134 = dma.vmem_to_hbm [thread:$0]  %s129_s9, 256, %s305_s2, [#allocation4], %s229_s19, %s229_s19, %s230_s20  }
  0x3e   :  { %226 = dma.done.wait [#allocation4], 256  }
  0x3f   :  { %227 = vsyncadd [#allocation4], 4294967040 }
  0x40   :  { %138 = vsyncpa [#allocation3], 1 }
  0x41   :  { %139 = vsyncpa [#allocation6], 1 }
  0x42   :  { %140 = vsyncpa [#allocation4], 1 }

</bundles_post_ra>
